<compile_context>
chip_gen: v7x
topology: tpu7x:2x2x1
jax: 0.10.0
libtpu: 0.0.40
codegen_flags: <defaults>
</compile_context>

<pallas_src>
import jax
import jax.numpy as jnp
from jax.experimental import pallas as pl
from jax.experimental.pallas import tpu as pltpu

NUM_STAGES = 4      # depth of the pipeline (len(stages) * stages-per-rank)
CHUNKS     = 4      # number of microbatches (scheduling detail only; fusion is free)
BATCH      = 32     # total batch; all microbatch chunks fused into one slab
HIDDEN     = 128    # model width (128-lane aligned)
HALF       = BATCH // 2   # static in-kernel "1F1B" interleave width


def _interleaver_kernel(x_ref, w_ref, b_ref, o_ref):
    # x_ref: (BATCH, HIDDEN) bf16                 — full batch, MXU-native dtype
    # w_ref: (NUM_STAGES, HIDDEN, HIDDEN) bf16    — stacked per-stage weights
    # b_ref: (NUM_STAGES, HIDDEN) f32             — stacked per-stage biases (flat)
    # o_ref: (BATCH, HIDDEN) f32
    #
    # Two independent half-batch dependency chains (static software 1F1B):
    # while half A runs its f32 bias/ReLU/bf16-repack epilogue on the VPU,
    # half B's matmul for the same stage pushes into the MXU.
    h = [x_ref[0:HALF, :], x_ref[HALF:BATCH, :]]          # bf16, clean vreg halves
    for s in range(NUM_STAGES):                           # static unrolled stage chain
        w = w_ref[s]                                      # (HIDDEN, HIDDEN) bf16
        b = b_ref[s:s + 1, :]                             # (1, HIDDEN) f32, broadcasts
        for p in range(2):
            # bf16 x bf16 MXU matmul with f32 accumulation; bias/ReLU in f32 (VPU).
            acc = jnp.dot(h[p], w, preferred_element_type=jnp.float32) + b
            if s < NUM_STAGES - 1:
                h[p] = jnp.maximum(acc, 0.0).astype(jnp.bfloat16)
            else:
                h[p] = acc                                # last stage: no ReLU, stays f32
    o_ref[0:HALF, :] = h[0].astype(o_ref.dtype)
    o_ref[HALF:BATCH, :] = h[1].astype(o_ref.dtype)


def stage_interleaver_forward(x_bf16, weights_bf16, biases_f32):
    """x: [BATCH,HIDDEN] bf16; weights: [S,H,H] bf16; biases: [S,H] f32 -> f32 [BATCH,HIDDEN]."""
    flops = 2 * BATCH * HIDDEN * HIDDEN * NUM_STAGES
    bytes_accessed = (
        x_bf16.size * x_bf16.dtype.itemsize
        + weights_bf16.size * weights_bf16.dtype.itemsize
        + biases_f32.size * biases_f32.dtype.itemsize
        + BATCH * HIDDEN * 4                              # f32 output
    )
    vmem = pl.BlockSpec(memory_space=pltpu.MemorySpace.VMEM)
    return pl.pallas_call(
        _interleaver_kernel,
        out_shape=jax.ShapeDtypeStruct((BATCH, HIDDEN), jnp.float32),
        # Gridless call, ~0.2 MiB working set explicitly pinned in VMEM.
        in_specs=[vmem, vmem, vmem],
        out_specs=vmem,
        cost_estimate=pl.CostEstimate(
            flops=flops, transcendentals=0, bytes_accessed=bytes_accessed),
    )(x_bf16, weights_bf16, biases_f32)


def _reference(x_bf16, weights_bf16, biases_f32):
    # Mirrors the kernel's precision choices exactly: bf16 MXU operands,
    # f32 accumulation, f32 bias/ReLU, per-stage bf16 repack, no ReLU on the
    # last stage.  (The bf16 activation recast is a deliberate ~1e-2
    # precision delta vs. the PyTorch f32 Linear module.)
    h = x_bf16
    for s in range(NUM_STAGES):
        acc = jnp.dot(h, weights_bf16[s], preferred_element_type=jnp.float32)
        acc = acc + biases_f32[s][None, :]
        if s < NUM_STAGES - 1:
            h = jnp.maximum(acc, 0.0).astype(jnp.bfloat16)
        else:
            h = acc
    return h


if __name__ == "__main__":
    key = jax.random.PRNGKey(0)
    kx, kw, kb = jax.random.split(key, 3)

    # Inputs stored bf16 (MXU-native, half the input DMA); params are
    # deterministic synthetic per-stage Linear weights (kaiming-ish scale).
    x = jax.random.normal(kx, (BATCH, HIDDEN), dtype=jnp.float32).astype(jnp.bfloat16)
    weights = jax.random.normal(kw, (NUM_STAGES, HIDDEN, HIDDEN), dtype=jnp.float32)
    weights_bf16 = (weights * (1.0 / jnp.sqrt(jnp.float32(HIDDEN)))).astype(jnp.bfloat16)
    biases = 0.01 * jax.random.normal(kb, (NUM_STAGES, HIDDEN), dtype=jnp.float32)

    out = stage_interleaver_forward(x, weights_bf16, biases)
    out = jax.block_until_ready(out)

    ref = _reference(x, weights_bf16, biases)
    assert out.shape == (BATCH, HIDDEN)
    assert out.dtype == jnp.float32
    assert jnp.allclose(out, ref, atol=1e-2, rtol=1e-2), "mismatch vs reference"

    print("KERNEL_OK")
</pallas_src>

<mosaic_0001>
module attributes {stable_mosaic.version = 11 : i64} {
  func.func @_interleaver_kernel(%arg0: memref<32x128xbf16, #tpu.memory_space<vmem>>, %arg1: memref<4x128x128xbf16, #tpu.memory_space<vmem>>, %arg2: memref<4x128xf32, #tpu.memory_space<vmem>>, %arg3: memref<32x128xf32, #tpu.memory_space<vmem>>) attributes {dimension_semantics = [], scalar_prefetch = 0 : i64, scratch_operands = 0 : i64, tpu.core_type = #tpu.core_type<tc>} {
    %c0 = arith.constant 0 : index
    %c0_0 = arith.constant 0 : index
    %0 = vector.load %arg0[%c0, %c0_0] : memref<32x128xbf16, #tpu.memory_space<vmem>>, vector<16x128xbf16>
    %c16 = arith.constant 16 : index
    %c0_1 = arith.constant 0 : index
    %1 = vector.load %arg0[%c16, %c0_1] : memref<32x128xbf16, #tpu.memory_space<vmem>>, vector<16x128xbf16>
    %c0_2 = arith.constant 0 : index
    %c0_3 = arith.constant 0 : index
    %c0_4 = arith.constant 0 : index
    %2 = vector.load %arg1[%c0_2, %c0_3, %c0_4] : memref<4x128x128xbf16, #tpu.memory_space<vmem>>, vector<1x128x128xbf16>
    %3 = vector.shape_cast %2 : vector<1x128x128xbf16> to vector<128x128xbf16>
    %c0_5 = arith.constant 0 : index
    %c0_6 = arith.constant 0 : index
    %4 = vector.load %arg2[%c0_5, %c0_6] : memref<4x128xf32, #tpu.memory_space<vmem>>, vector<1x128xf32>
    %cst = arith.constant dense<0.000000e+00> : vector<16x128xf32>
    %5 = tpu.matmul %0, %3, %cst {dimension_numbers = #tpu.dot_dimension_numbers<[1], [0], [0], [1], [0, 0, 1, 1], [], []>} : vector<16x128xbf16>, vector<128x128xbf16>, vector<16x128xf32> -> vector<16x128xf32>
    %6 = vector.broadcast %4 : vector<1x128xf32> to vector<16x128xf32>
    %7 = arith.addf %5, %6 : vector<16x128xf32>
    %cst_7 = arith.constant 0.000000e+00 : f32
    %8 = vector.broadcast %cst_7 : f32 to vector<16x128xf32>
    %9 = arith.maximumf %7, %8 : vector<16x128xf32>
    %10 = arith.truncf %9 : vector<16x128xf32> to vector<16x128xbf16>
    %cst_8 = arith.constant dense<0.000000e+00> : vector<16x128xf32>
    %11 = tpu.matmul %1, %3, %cst_8 {dimension_numbers = #tpu.dot_dimension_numbers<[1], [0], [0], [1], [0, 0, 1, 1], [], []>} : vector<16x128xbf16>, vector<128x128xbf16>, vector<16x128xf32> -> vector<16x128xf32>
    %12 = vector.broadcast %4 : vector<1x128xf32> to vector<16x128xf32>
    %13 = arith.addf %11, %12 : vector<16x128xf32>
    %cst_9 = arith.constant 0.000000e+00 : f32
    %14 = vector.broadcast %cst_9 : f32 to vector<16x128xf32>
    %15 = arith.maximumf %13, %14 : vector<16x128xf32>
    %16 = arith.truncf %15 : vector<16x128xf32> to vector<16x128xbf16>
    %c1 = arith.constant 1 : index
    %c0_10 = arith.constant 0 : index
    %c0_11 = arith.constant 0 : index
    %17 = vector.load %arg1[%c1, %c0_10, %c0_11] : memref<4x128x128xbf16, #tpu.memory_space<vmem>>, vector<1x128x128xbf16>
    %18 = vector.shape_cast %17 : vector<1x128x128xbf16> to vector<128x128xbf16>
    %c1_12 = arith.constant 1 : index
    %c0_13 = arith.constant 0 : index
    %19 = vector.load %arg2[%c1_12, %c0_13] : memref<4x128xf32, #tpu.memory_space<vmem>>, vector<1x128xf32>
    %cst_14 = arith.constant dense<0.000000e+00> : vector<16x128xf32>
    %20 = tpu.matmul %10, %18, %cst_14 {dimension_numbers = #tpu.dot_dimension_numbers<[1], [0], [0], [1], [0, 0, 1, 1], [], []>} : vector<16x128xbf16>, vector<128x128xbf16>, vector<16x128xf32> -> vector<16x128xf32>
    %21 = vector.broadcast %19 : vector<1x128xf32> to vector<16x128xf32>
    %22 = arith.addf %20, %21 : vector<16x128xf32>
    %cst_15 = arith.constant 0.000000e+00 : f32
    %23 = vector.broadcast %cst_15 : f32 to vector<16x128xf32>
    %24 = arith.maximumf %22, %23 : vector<16x128xf32>
    %25 = arith.truncf %24 : vector<16x128xf32> to vector<16x128xbf16>
    %cst_16 = arith.constant dense<0.000000e+00> : vector<16x128xf32>
    %26 = tpu.matmul %16, %18, %cst_16 {dimension_numbers = #tpu.dot_dimension_numbers<[1], [0], [0], [1], [0, 0, 1, 1], [], []>} : vector<16x128xbf16>, vector<128x128xbf16>, vector<16x128xf32> -> vector<16x128xf32>
    %27 = vector.broadcast %19 : vector<1x128xf32> to vector<16x128xf32>
    %28 = arith.addf %26, %27 : vector<16x128xf32>
    %cst_17 = arith.constant 0.000000e+00 : f32
    %29 = vector.broadcast %cst_17 : f32 to vector<16x128xf32>
    %30 = arith.maximumf %28, %29 : vector<16x128xf32>
    %31 = arith.truncf %30 : vector<16x128xf32> to vector<16x128xbf16>
    %c2 = arith.constant 2 : index
    %c0_18 = arith.constant 0 : index
    %c0_19 = arith.constant 0 : index
    %32 = vector.load %arg1[%c2, %c0_18, %c0_19] : memref<4x128x128xbf16, #tpu.memory_space<vmem>>, vector<1x128x128xbf16>
    %33 = vector.shape_cast %32 : vector<1x128x128xbf16> to vector<128x128xbf16>
    %c2_20 = arith.constant 2 : index
    %c0_21 = arith.constant 0 : index
    %34 = vector.load %arg2[%c2_20, %c0_21] : memref<4x128xf32, #tpu.memory_space<vmem>>, vector<1x128xf32>
    %cst_22 = arith.constant dense<0.000000e+00> : vector<16x128xf32>
    %35 = tpu.matmul %25, %33, %cst_22 {dimension_numbers = #tpu.dot_dimension_numbers<[1], [0], [0], [1], [0, 0, 1, 1], [], []>} : vector<16x128xbf16>, vector<128x128xbf16>, vector<16x128xf32> -> vector<16x128xf32>
    %36 = vector.broadcast %34 : vector<1x128xf32> to vector<16x128xf32>
    %37 = arith.addf %35, %36 : vector<16x128xf32>
    %cst_23 = arith.constant 0.000000e+00 : f32
    %38 = vector.broadcast %cst_23 : f32 to vector<16x128xf32>
    %39 = arith.maximumf %37, %38 : vector<16x128xf32>
    %40 = arith.truncf %39 : vector<16x128xf32> to vector<16x128xbf16>
    %cst_24 = arith.constant dense<0.000000e+00> : vector<16x128xf32>
    %41 = tpu.matmul %31, %33, %cst_24 {dimension_numbers = #tpu.dot_dimension_numbers<[1], [0], [0], [1], [0, 0, 1, 1], [], []>} : vector<16x128xbf16>, vector<128x128xbf16>, vector<16x128xf32> -> vector<16x128xf32>
    %42 = vector.broadcast %34 : vector<1x128xf32> to vector<16x128xf32>
    %43 = arith.addf %41, %42 : vector<16x128xf32>
    %cst_25 = arith.constant 0.000000e+00 : f32
    %44 = vector.broadcast %cst_25 : f32 to vector<16x128xf32>
    %45 = arith.maximumf %43, %44 : vector<16x128xf32>
    %46 = arith.truncf %45 : vector<16x128xf32> to vector<16x128xbf16>
    %c3 = arith.constant 3 : index
    %c0_26 = arith.constant 0 : index
    %c0_27 = arith.constant 0 : index
    %47 = vector.load %arg1[%c3, %c0_26, %c0_27] : memref<4x128x128xbf16, #tpu.memory_space<vmem>>, vector<1x128x128xbf16>
    %48 = vector.shape_cast %47 : vector<1x128x128xbf16> to vector<128x128xbf16>
    %c3_28 = arith.constant 3 : index
    %c0_29 = arith.constant 0 : index
    %49 = vector.load %arg2[%c3_28, %c0_29] : memref<4x128xf32, #tpu.memory_space<vmem>>, vector<1x128xf32>
    %cst_30 = arith.constant dense<0.000000e+00> : vector<16x128xf32>
    %50 = tpu.matmul %40, %48, %cst_30 {dimension_numbers = #tpu.dot_dimension_numbers<[1], [0], [0], [1], [0, 0, 1, 1], [], []>} : vector<16x128xbf16>, vector<128x128xbf16>, vector<16x128xf32> -> vector<16x128xf32>
    %51 = vector.broadcast %49 : vector<1x128xf32> to vector<16x128xf32>
    %52 = arith.addf %50, %51 : vector<16x128xf32>
    %cst_31 = arith.constant dense<0.000000e+00> : vector<16x128xf32>
    %53 = tpu.matmul %46, %48, %cst_31 {dimension_numbers = #tpu.dot_dimension_numbers<[1], [0], [0], [1], [0, 0, 1, 1], [], []>} : vector<16x128xbf16>, vector<128x128xbf16>, vector<16x128xf32> -> vector<16x128xf32>
    %54 = vector.broadcast %49 : vector<1x128xf32> to vector<16x128xf32>
    %55 = arith.addf %53, %54 : vector<16x128xf32>
    %c0_32 = arith.constant 0 : index
    %c0_33 = arith.constant 0 : index
    %56 = vector.load %arg3[%c0_32, %c0_33] : memref<32x128xf32, #tpu.memory_space<vmem>>, vector<16x128xf32>
    tpu.vector_store %arg3[%c0_32, %c0_33], %52 {strides = array<i32>} : memref<32x128xf32, #tpu.memory_space<vmem>>, vector<16x128xf32>,
    %c16_34 = arith.constant 16 : index
    %c0_35 = arith.constant 0 : index
    %57 = vector.load %arg3[%c16_34, %c0_35] : memref<32x128xf32, #tpu.memory_space<vmem>>, vector<16x128xf32>
    tpu.vector_store %arg3[%c16_34, %c0_35], %55 {strides = array<i32>} : memref<32x128xf32, #tpu.memory_space<vmem>>, vector<16x128xf32>,
    return
  }
}

</mosaic_0001>

<bundles_post_ra>
// kernel: tpu_custom_call.1
= control target key start
LH: loop header
LB: loop body
LE: loop exit
PB: predicated region body
PF: predicated region fallthrough
CT: control target
= control target key end

     0   :  { %8 = vsyncpa [#allocation3], 0  ;;  %s1249_s0 = inlined_call_operand.hbm [shape: bf16[32,128], index: 0, kind: input, shape index: {}]   ;;  %s1250_s1 = inlined_call_operand.hbm [shape: bf16[4,128,128], index: 1, kind: input, shape index: {}]   ;;  %s1251_s2 = inlined_call_operand.vmem [shape: f32[4,128], index: 2, kind: input, shape index: {}]   ;;  %s1252_s3 = inlined_call_operand.hbm [shape: f32[32,128], index: 3, kind: output, shape index: {}]  }
   0x1   :  { %9 = vsyncpa [#allocation6], 0 }
   0x2   :  { %10 = vsyncpa [#allocation4], 0  ;;  %s1092_s12 = smov [#allocation2]   ;;  %s1020_s16 = scalar_lea.hbm %s1249_s0, 256 }
   0x3   :  { %s16_s13 = sshll.u32 %s1092_s12, 4  ;;  %p1021_p0 = scmp.ne.s32.totalorder %s1249_s0, %s1020_s16  ;;  %s17_s13 = int_to_ptr.vmem [resolvable:$true] %s16_s13 }
   0x4   :  { %p1024_p1 = scmp.lt.u32.totalorder %s1020_s16, %s1249_s0 }
   0x6   :  { %p1026_p2 = pnand %p1024_p1, %p1021_p0 }
   0x8   :  { %1029 = shalt.err (!%p1026_p2)
}
   0x9   :  { %s1030_s21 = scalar_lea.vmem %s17_s13, 256  ;;  %p1035_p4 = scmp.lt.s32.totalorder %s17_s13, %s17_s13 }
   0xa   :  { %p1031_p3 = scmp.ne.s32.totalorder %s17_s13, %s1030_s21  ;;  %p1036_p5 = scmp.lt.s32.totalorder %s1030_s21, %s1030_s21 }
   0xc   :  { %p1037_p6 = por %p1036_p5, %p1035_p4 }
   0xe   :  { %p1038_p7 = pnand %p1037_p6, %p1031_p3 }
  0x10   :  { %1041 = shalt.err (!%p1038_p7)
}
  0x11   :  { %s1093_s22 = smov 64   ;;  %s1094_s23 = smov 4  }
  0x12   :  { %22 = dma.hbm_to_vmem [thread:$0]  %s1249_s0, 256, %s17_s13, [#allocation3], %s1093_s22, %s1093_s22, %s1094_s23  }
  0x13   :  { %s1095_s26 = smov [#allocation5]   ;;  %s1042_s30 = scalar_lea.hbm %s1250_s1, 4096 }
  0x14   :  { %s28_s27 = sshll.u32 %s1095_s26, 4  ;;  %p1043_p8 = scmp.ne.s32.totalorder %s1250_s1, %s1042_s30  ;;  %s29_s27 = int_to_ptr.vmem [resolvable:$true] %s28_s27 }
  0x15   :  { %p1046_p9 = scmp.lt.u32.totalorder %s1042_s30, %s1250_s1 }
  0x17   :  { %p1048_p10 = pnand %p1046_p9, %p1043_p8 }
  0x19   :  { %1051 = shalt.err (!%p1048_p10)
}
  0x1a   :  { %s1052_s8 = scalar_lea.vmem %s29_s27, 4096  ;;  %p1057_p12 = scmp.lt.s32.totalorder %s29_s27, %s29_s27 }
  0x1b   :  { %p1053_p11 = scmp.ne.s32.totalorder %s29_s27, %s1052_s8  ;;  %p1058_p13 = scmp.lt.s32.totalorder %s1052_s8, %s1052_s8 }
  0x1d   :  { %p1059_p0 = por %p1058_p13, %p1057_p12 }
  0x1f   :  { %p1060_p1 = pnand %p1059_p0, %p1053_p11 }
  0x21   :  { %1063 = shalt.err (!%p1060_p1)
}
  0x22   :  { %34 = dma.hbm_to_vmem [thread:$0]  %s1250_s1, 4096, %s29_s27, [#allocation6], %s1093_s22, %s1093_s22, %s1094_s23  }
  0x23   :  { %1086 = dma.done.wait [#allocation3], 256  }
  0x24   :  { %1087 = vsyncadd [#allocation3], 4294967040 }
  0x25   :  { %1088 = dma.done.wait [#allocation6], 4096  }
  0x26   :  { %1089 = vsyncadd [#allocation6], 4294963200  ;;  %v1096_v0 = vmov 0.0   ;;  %vm1097_vm0 = vmmov 0   ;;  %v986_v1 = vld [vmem:[#allocation5] sm:$0xff]   ;;  %v987_v2 = vld [vmem:[#allocation5 + $0x8] sm:$0xff]  }
  0x27   :  { %817 = vmatprep.subr.bf16.mxu0 %v1096_v0  ;;  %837 = vmatprep.subr.bf16.mxu1 %v1096_v0  ;;  %v988_v3 = vld [vmem:[#allocation5 + $0x10] sm:$0xff]   ;;  %v989_v4 = vld [vmem:[#allocation5 + $0x18] sm:$0xff]   ;;  %v990_v5 = vld [vmem:[#allocation5 + $0x20] sm:$0xff]   ;;  %s1098_s17 = smov [#allocation7]  }
  0x28   :  { %833 = vmatprep.mubr.msk.bf16.mxu0 %vm1097_vm0, %v1096_v0  ;;  %853 = vmatprep.mubr.msk.bf16.mxu1 %vm1097_vm0, %v1096_v0  ;;  %v991_v6 = vld [vmem:[#allocation5 + $0x28] sm:$0xff]   ;;  %v992_v7 = vld [vmem:[#allocation5 + $0x30] sm:$0xff]   ;;  %v993_v8 = vld [vmem:[#allocation5 + $0x38] sm:$0xff]   ;;  %s694_s18 = sshll.u32 %s1098_s17, 4  ;;  %s695_s18 = int_to_ptr.vmem [resolvable:$true] %s694_s18 }
  0x29   :  { %818 = vmatpush3.bf16.msra.mxu0 %v986_v1  ;;  %838 = vmatpush3.bf16.msra.mxu1 %v986_v1  ;;  %v994_v9 = vld [vmem:[#allocation2] sm:$0xff]   ;;  %v995_v10 = vld [vmem:[#allocation2 + $0x8] sm:$0xff]   ;;  %v996_v11 = vld [vmem:[#allocation5 + $0x40] sm:$0xff]   ;;  %p1069_p3 = scmp.lt.s32.totalorder %s695_s18, %s695_s18 }
  0x2a   :  { %819 = vmatprep.subr.bf16.mxu0 %v1096_v0  ;;  %839 = vmatprep.subr.bf16.mxu1 %v1096_v0  ;;  %v997_v12 = vld [vmem:[#allocation5 + $0x48] sm:$0xff]   ;;  %v998_v13 = vld [vmem:[#allocation5 + $0x50] sm:$0xff]   ;;  %v999_v14 = vld [vmem:[#allocation5 + $0x58] sm:$0xff]  }
  0x2b   :  { %v1000_v15 = vld [vmem:[#allocation5 + $0x60] sm:$0xff]   ;;  %v1001_v16 = vld [vmem:[#allocation5 + $0x68] sm:$0xff]   ;;  %v1002_v17 = vld [vmem:[#allocation5 + $0x70] sm:$0xff]  }
  0x2c   :  { %v1003_v18 = vld [vmem:[#allocation5 + $0x78] sm:$0xff]   ;;  %v707_v19 = vld [vmem:[%s1251_s2] ss:$0 sm:$0xff]  ;;  %v1004_v36 = vld [vmem:[#allocation5 + $0x80] sm:$0xff]  }
  0x2d   :  { %820 = vmatpush3.bf16.msra.mxu0 %v987_v2  ;;  %840 = vmatpush3.bf16.msra.mxu1 %v987_v2  ;;  %v1005_v39 = vld [vmem:[#allocation5 + $0x88] sm:$0xff]   ;;  %v1006_v40 = vld [vmem:[#allocation5 + $0x90] sm:$0xff]   ;;  %v1007_v41 = vld [vmem:[#allocation5 + $0x98] sm:$0xff]  }
  0x2e   :  { %821 = vmatprep.subr.bf16.mxu0 %v1096_v0  ;;  %841 = vmatprep.subr.bf16.mxu1 %v1096_v0  ;;  %v1008_v42 = vld [vmem:[#allocation5 + $0xa0] sm:$0xff]   ;;  %v1009_v43 = vld [vmem:[#allocation5 + $0xa8] sm:$0xff]   ;;  %v1010_v44 = vld [vmem:[#allocation5 + $0xb0] sm:$0xff]  }
  0x2f   :  { %v1011_v45 = vld [vmem:[#allocation5 + $0xb8] sm:$0xff]   ;;  %v718_v46 = vld [vmem:[%s1251_s2 + $0x1] ss:$0 sm:$0xff]  ;;  %v1012_v63 = vld [vmem:[#allocation5 + $0xc0] sm:$0xff]  }
  0x31   :  { %822 = vmatpush3.bf16.msra.mxu0 %v988_v3  ;;  %842 = vmatpush3.bf16.msra.mxu1 %v988_v3  ;;  %v1013_v3 = vld [vmem:[#allocation5 + $0xc8] sm:$0xff]  }
  0x32   :  { %823 = vmatprep.subr.bf16.mxu0 %v1096_v0  ;;  %843 = vmatprep.subr.bf16.mxu1 %v1096_v0 }
  0x35   :  { %824 = vmatpush3.bf16.msra.mxu0 %v989_v4  ;;  %844 = vmatpush3.bf16.msra.mxu1 %v989_v4  ;;  %v1014_v4 = vld [vmem:[#allocation5 + $0xd0] sm:$0xff]  }
  0x36   :  { %825 = vmatprep.subr.bf16.mxu0 %v1096_v0  ;;  %845 = vmatprep.subr.bf16.mxu1 %v1096_v0 }
  0x39   :  { %826 = vmatpush3.bf16.msra.mxu0 %v990_v5  ;;  %846 = vmatpush3.bf16.msra.mxu1 %v990_v5  ;;  %v1015_v5 = vld [vmem:[#allocation5 + $0xd8] sm:$0xff]  }
  0x3a   :  { %827 = vmatprep.subr.bf16.mxu0 %v1096_v0  ;;  %847 = vmatprep.subr.bf16.mxu1 %v1096_v0 }
  0x3d   :  { %828 = vmatpush3.bf16.msra.mxu0 %v991_v6  ;;  %848 = vmatpush3.bf16.msra.mxu1 %v991_v6  ;;  %v1016_v6 = vld [vmem:[#allocation5 + $0xe0] sm:$0xff]  }
  0x3e   :  { %829 = vmatprep.subr.bf16.mxu0 %v1096_v0  ;;  %849 = vmatprep.subr.bf16.mxu1 %v1096_v0 }
  0x41   :  { %830 = vmatpush3.bf16.msra.mxu0 %v992_v7  ;;  %850 = vmatpush3.bf16.msra.mxu1 %v992_v7  ;;  %v1017_v7 = vld [vmem:[#allocation5 + $0xe8] sm:$0xff]  }
  0x42   :  { %831 = vmatprep.subr.bf16.mxu0 %v1096_v0  ;;  %851 = vmatprep.subr.bf16.mxu1 %v1096_v0 }
  0x45   :  { %832 = vmatpush3.bf16.msra.mxu0 %v993_v8  ;;  %852 = vmatpush3.bf16.msra.mxu1 %v993_v8  ;;  %v1018_v8 = vld [vmem:[#allocation5 + $0xf0] sm:$0xff]  }
  0x46   :  { %857 = vmatprep.subr.bf16.mxu0 %v1096_v0  ;;  %877 = vmatprep.subr.bf16.mxu1 %v1096_v0 }
  0x48   :  { %834 = vmatmul.mubr.bf16.vlgmr.msra.gmra.mrb[0].mxu0 %v994_v9  ;;  %854 = vmatmul.mubr.bf16.vlgmr.msra.gmra.mrb[0].mxu1 %v995_v10  ;;  %v1019_v9 = vld [vmem:[#allocation5 + $0xf8] sm:$0xff]   ;;  %v727_v10 = vld [vmem:[%s1251_s2 + $0x2] ss:$0 sm:$0xff] }
  0x49   :  { %858 = vmatpush3.bf16.msra.mxu0 %v996_v11  ;;  %878 = vmatpush3.bf16.msra.mxu1 %v996_v11 }
  0x4a   :  { %859 = vmatprep.subr.bf16.mxu0 %v1096_v0  ;;  %879 = vmatprep.subr.bf16.mxu1 %v1096_v0 }
  0x4b   :  { %873 = vmatprep.mubr.msk.bf16.mxu0 %vm1097_vm0, %v1096_v0  ;;  %893 = vmatprep.mubr.msk.bf16.mxu1 %vm1097_vm0, %v1096_v0 }
  0x4d   :  { %860 = vmatpush3.bf16.msra.mxu0 %v997_v12  ;;  %880 = vmatpush3.bf16.msra.mxu1 %v997_v12 }
  0x4e   :  { %861 = vmatprep.subr.bf16.mxu0 %v1096_v0  ;;  %881 = vmatprep.subr.bf16.mxu1 %v1096_v0 }
  0x51   :  { %862 = vmatpush3.bf16.msra.mxu0 %v998_v13  ;;  %882 = vmatpush3.bf16.msra.mxu1 %v998_v13 }
  0x52   :  { %863 = vmatprep.subr.bf16.mxu0 %v1096_v0  ;;  %883 = vmatprep.subr.bf16.mxu1 %v1096_v0 }
  0x55   :  { %864 = vmatpush3.bf16.msra.mxu0 %v999_v14  ;;  %884 = vmatpush3.bf16.msra.mxu1 %v999_v14 }
  0x56   :  { %865 = vmatprep.subr.bf16.mxu0 %v1096_v0  ;;  %885 = vmatprep.subr.bf16.mxu1 %v1096_v0 }
  0x59   :  { %866 = vmatpush3.bf16.msra.mxu0 %v1000_v15  ;;  %886 = vmatpush3.bf16.msra.mxu1 %v1000_v15 }
  0x5a   :  { %867 = vmatprep.subr.bf16.mxu0 %v1096_v0  ;;  %887 = vmatprep.subr.bf16.mxu1 %v1096_v0 }
  0x5d   :  { %868 = vmatpush3.bf16.msra.mxu0 %v1001_v16  ;;  %888 = vmatpush3.bf16.msra.mxu1 %v1001_v16 }
  0x5e   :  { %869 = vmatprep.subr.bf16.mxu0 %v1096_v0  ;;  %889 = vmatprep.subr.bf16.mxu1 %v1096_v0 }
  0x61   :  { %870 = vmatpush3.bf16.msra.mxu0 %v1002_v17  ;;  %890 = vmatpush3.bf16.msra.mxu1 %v1002_v17 }
  0x62   :  { %871 = vmatprep.subr.bf16.mxu0 %v1096_v0  ;;  %891 = vmatprep.subr.bf16.mxu1 %v1096_v0 }
  0x65   :  { %872 = vmatpush3.bf16.msra.mxu0 %v1003_v18  ;;  %892 = vmatpush3.bf16.msra.mxu1 %v1003_v18 }
  0x66   :  { %897 = vmatprep.subr.bf16.mxu0 %v1096_v0  ;;  %917 = vmatprep.subr.bf16.mxu1 %v1096_v0 }
 0x11b   :  { %v157_v20 = vpop.f32.mrb[0].mxu0  ;;  %v207_v21 = vpop.f32.mrb[0].mxu1 }
 0x11c   :  { %v158_v22 = vadd.f32 %v707_v19, %v157_v20  ;;  %v208_v23 = vadd.f32 %v707_v19, %v207_v21  ;;  %v835_v24 = vpop.f32.mrb[1].mxu0  ;;  %v855_v25 = vpop.f32.mrb[1].mxu1 }
 0x11d   :  { %v160_v26 = vpop.f32.mrb[2].mxu0  ;;  %v210_v27 = vpop.f32.mrb[2].mxu1 }
 0x11e   :  { %v161_v28 = vadd.f32 %v707_v19, %v160_v26  ;;  %v211_v29 = vadd.f32 %v707_v19, %v210_v27  ;;  %v836_v30 = vpop.f32.mrb[3].mxu0  ;;  %v856_v31 = vpop.f32.mrb[3].mxu1  ;;  %v164_v32 = vmax.f32 %v158_v22, 0.0  ;;  %v214_v33 = vmax.f32 %v208_v23, 0.0 }
 0x120   :  { %v165_v34 = vmax.f32 %v161_v28, 0.0  ;;  %v215_v35 = vmax.f32 %v211_v29, 0.0  ;;  %v736_v28 = vld [vmem:[%s1251_s2 + $0x3] ss:$0 sm:$0xff]  ;;  %s1064_s2 = scalar_lea.vmem %s695_s18, 512 }
 0x121   :  { %p1065_p2 = scmp.ne.s32.totalorder %s695_s18, %s1064_s2  ;;  %p1070_p4 = scmp.lt.s32.totalorder %s1064_s2, %s1064_s2 }
 0x122   :  { %v166_v37 = vpack.c.bf16 %v165_v34, %v164_v32  ;;  %v216_v38 = vpack.c.bf16 %v215_v35, %v214_v33 }
 0x123   :  { %p1071_p5 = por %p1070_p4, %p1069_p3 }
 0x124   :  { %874 = vmatmul.mubr.bf16.vlgmr.msra.gmra.mrb[4].mxu0 %v166_v37  ;;  %894 = vmatmul.mubr.bf16.vlgmr.msra.gmra.mrb[4].mxu1 %v216_v38 }
 0x125   :  { %898 = vmatpush3.bf16.msra.mxu0 %v1004_v36  ;;  %918 = vmatpush3.bf16.msra.mxu1 %v1004_v36  ;;  %p1072_p6 = pnand %p1071_p5, %p1065_p2 }
 0x126   :  { %899 = vmatprep.subr.bf16.mxu0 %v1096_v0  ;;  %919 = vmatprep.subr.bf16.mxu1 %v1096_v0 }
 0x127   :  { %913 = vmatprep.mubr.msk.bf16.mxu0 %vm1097_vm0, %v1096_v0  ;;  %933 = vmatprep.mubr.msk.bf16.mxu1 %vm1097_vm0, %v1096_v0 }
 0x129   :  { %900 = vmatpush3.bf16.msra.mxu0 %v1005_v39  ;;  %920 = vmatpush3.bf16.msra.mxu1 %v1005_v39 }
 0x12a   :  { %901 = vmatprep.subr.bf16.mxu0 %v1096_v0  ;;  %921 = vmatprep.subr.bf16.mxu1 %v1096_v0 }
 0x12d   :  { %902 = vmatpush3.bf16.msra.mxu0 %v1006_v40  ;;  %922 = vmatpush3.bf16.msra.mxu1 %v1006_v40 }
 0x12e   :  { %903 = vmatprep.subr.bf16.mxu0 %v1096_v0  ;;  %923 = vmatprep.subr.bf16.mxu1 %v1096_v0 }
 0x131   :  { %904 = vmatpush3.bf16.msra.mxu0 %v1007_v41  ;;  %924 = vmatpush3.bf16.msra.mxu1 %v1007_v41 }
 0x132   :  { %905 = vmatprep.subr.bf16.mxu0 %v1096_v0  ;;  %925 = vmatprep.subr.bf16.mxu1 %v1096_v0 }
 0x135   :  { %906 = vmatpush3.bf16.msra.mxu0 %v1008_v42  ;;  %926 = vmatpush3.bf16.msra.mxu1 %v1008_v42 }
 0x136   :  { %907 = vmatprep.subr.bf16.mxu0 %v1096_v0  ;;  %927 = vmatprep.subr.bf16.mxu1 %v1096_v0 }
 0x139   :  { %908 = vmatpush3.bf16.msra.mxu0 %v1009_v43  ;;  %928 = vmatpush3.bf16.msra.mxu1 %v1009_v43 }
 0x13a   :  { %909 = vmatprep.subr.bf16.mxu0 %v1096_v0  ;;  %929 = vmatprep.subr.bf16.mxu1 %v1096_v0 }
 0x13d   :  { %910 = vmatpush3.bf16.msra.mxu0 %v1010_v44  ;;  %930 = vmatpush3.bf16.msra.mxu1 %v1010_v44 }
 0x13e   :  { %911 = vmatprep.subr.bf16.mxu0 %v1096_v0  ;;  %931 = vmatprep.subr.bf16.mxu1 %v1096_v0 }
 0x141   :  { %912 = vmatpush3.bf16.msra.mxu0 %v1011_v45  ;;  %932 = vmatpush3.bf16.msra.mxu1 %v1011_v45 }
 0x142   :  { %937 = vmatprep.subr.bf16.mxu0 %v1096_v0  ;;  %957 = vmatprep.subr.bf16.mxu1 %v1096_v0 }
 0x1f7   :  { %v321_v47 = vpop.f32.mrb[4].mxu0  ;;  %v365_v48 = vpop.f32.mrb[4].mxu1 }
 0x1f8   :  { %v322_v49 = vadd.f32 %v718_v46, %v321_v47  ;;  %v366_v50 = vadd.f32 %v718_v46, %v365_v48  ;;  %v875_v51 = vpop.f32.mrb[5].mxu0  ;;  %v895_v52 = vpop.f32.mrb[5].mxu1 }
 0x1f9   :  { %v324_v53 = vpop.f32.mrb[6].mxu0  ;;  %v368_v54 = vpop.f32.mrb[6].mxu1 }
 0x1fa   :  { %v325_v55 = vadd.f32 %v718_v46, %v324_v53  ;;  %v369_v56 = vadd.f32 %v718_v46, %v368_v54  ;;  %v876_v57 = vpop.f32.mrb[7].mxu0  ;;  %v896_v58 = vpop.f32.mrb[7].mxu1  ;;  %v328_v59 = vmax.f32 %v322_v49, 0.0  ;;  %v372_v60 = vmax.f32 %v366_v50, 0.0 }
 0x1fc   :  { %v329_v61 = vmax.f32 %v325_v55, 0.0  ;;  %v373_v62 = vmax.f32 %v369_v56, 0.0 }
 0x1fe   :  { %v330_v1 = vpack.c.bf16 %v329_v61, %v328_v59  ;;  %v374_v2 = vpack.c.bf16 %v373_v62, %v372_v60 }
 0x200   :  { %914 = vmatmul.mubr.bf16.vlgmr.msra.gmra.mrb[8].mxu0 %v330_v1  ;;  %934 = vmatmul.mubr.bf16.vlgmr.msra.gmra.mrb[8].mxu1 %v374_v2 }
 0x201   :  { %938 = vmatpush3.bf16.msra.mxu0 %v1012_v63  ;;  %958 = vmatpush3.bf16.msra.mxu1 %v1012_v63 }
 0x202   :  { %939 = vmatprep.subr.bf16.mxu0 %v1096_v0  ;;  %959 = vmatprep.subr.bf16.mxu1 %v1096_v0 }
 0x203   :  { %953 = vmatprep.mubr.msk.bf16.mxu0 %vm1097_vm0, %v1096_v0  ;;  %973 = vmatprep.mubr.msk.bf16.mxu1 %vm1097_vm0, %v1096_v0 }
 0x205   :  { %940 = vmatpush3.bf16.msra.mxu0 %v1013_v3  ;;  %960 = vmatpush3.bf16.msra.mxu1 %v1013_v3 }
 0x206   :  { %941 = vmatprep.subr.bf16.mxu0 %v1096_v0  ;;  %961 = vmatprep.subr.bf16.mxu1 %v1096_v0 }
 0x209   :  { %942 = vmatpush3.bf16.msra.mxu0 %v1014_v4  ;;  %962 = vmatpush3.bf16.msra.mxu1 %v1014_v4 }
 0x20a   :  { %943 = vmatprep.subr.bf16.mxu0 %v1096_v0  ;;  %963 = vmatprep.subr.bf16.mxu1 %v1096_v0 }
 0x20d   :  { %944 = vmatpush3.bf16.msra.mxu0 %v1015_v5  ;;  %964 = vmatpush3.bf16.msra.mxu1 %v1015_v5 }
 0x20e   :  { %945 = vmatprep.subr.bf16.mxu0 %v1096_v0  ;;  %965 = vmatprep.subr.bf16.mxu1 %v1096_v0 }
 0x211   :  { %946 = vmatpush3.bf16.msra.mxu0 %v1016_v6  ;;  %966 = vmatpush3.bf16.msra.mxu1 %v1016_v6 }
 0x212   :  { %947 = vmatprep.subr.bf16.mxu0 %v1096_v0  ;;  %967 = vmatprep.subr.bf16.mxu1 %v1096_v0 }
 0x215   :  { %948 = vmatpush3.bf16.msra.mxu0 %v1017_v7  ;;  %968 = vmatpush3.bf16.msra.mxu1 %v1017_v7 }
 0x216   :  { %949 = vmatprep.subr.bf16.mxu0 %v1096_v0  ;;  %969 = vmatprep.subr.bf16.mxu1 %v1096_v0 }
 0x219   :  { %950 = vmatpush3.bf16.msra.mxu0 %v1018_v8  ;;  %970 = vmatpush3.bf16.msra.mxu1 %v1018_v8 }
 0x21a   :  { %951 = vmatprep.subr.bf16.mxu0 %v1096_v0  ;;  %971 = vmatprep.subr.bf16.mxu1 %v1096_v0 }
 0x21d   :  { %952 = vmatpush3.bf16.msra.mxu0 %v1019_v9  ;;  %972 = vmatpush3.bf16.msra.mxu1 %v1019_v9 }
 0x2d3   :  { %v479_v11 = vpop.f32.mrb[8].mxu0  ;;  %v523_v12 = vpop.f32.mrb[8].mxu1 }
 0x2d4   :  { %v480_v13 = vadd.f32 %v727_v10, %v479_v11  ;;  %v524_v14 = vadd.f32 %v727_v10, %v523_v12  ;;  %v915_v15 = vpop.f32.mrb[9].mxu0  ;;  %v935_v16 = vpop.f32.mrb[9].mxu1 }
 0x2d5   :  { %v482_v17 = vpop.f32.mrb[10].mxu0  ;;  %v526_v18 = vpop.f32.mrb[10].mxu1 }
 0x2d6   :  { %v483_v19 = vadd.f32 %v727_v10, %v482_v17  ;;  %v527_v20 = vadd.f32 %v727_v10, %v526_v18  ;;  %v916_v21 = vpop.f32.mrb[11].mxu0  ;;  %v936_v22 = vpop.f32.mrb[11].mxu1  ;;  %v486_v0 = vmax.f32 %v480_v13, 0.0  ;;  %v530_v23 = vmax.f32 %v524_v14, 0.0 }
 0x2d8   :  { %v487_v24 = vmax.f32 %v483_v19, 0.0  ;;  %v531_v25 = vmax.f32 %v527_v20, 0.0 }
 0x2da   :  { %v488_v26 = vpack.c.bf16 %v487_v24, %v486_v0  ;;  %v532_v27 = vpack.c.bf16 %v531_v25, %v530_v23 }
 0x2dc   :  { %954 = vmatmul.mubr.bf16.vlgmr.msra.gmra.mrb[12].mxu0 %v488_v26  ;;  %974 = vmatmul.mubr.bf16.vlgmr.msra.gmra.mrb[12].mxu1 %v532_v27 }
 0x3af   :  { %v637_v29 = vpop.f32.mrb[12].mxu0  ;;  %v678_v30 = vpop.f32.mrb[12].mxu1 }
 0x3b0   :  { %v638_v31 = vadd.f32 %v736_v28, %v637_v29  ;;  %v679_v32 = vadd.f32 %v736_v28, %v678_v30  ;;  %v955_v33 = vpop.f32.mrb[13].mxu0  ;;  %v975_v34 = vpop.f32.mrb[13].mxu1 }
 0x3b1   :  { %v640_v35 = vpop.f32.mrb[14].mxu0  ;;  %v681_v36 = vpop.f32.mrb[14].mxu1 }
 0x3b2   :  { %685 = vst [vmem:[#allocation7] sm:$0xff] %v638_v31  ;;  %687 = vst [vmem:[#allocation7 + $0x10] sm:$0xff] %v679_v32  ;;  %v641_v37 = vadd.f32 %v736_v28, %v640_v35  ;;  %v682_v38 = vadd.f32 %v736_v28, %v681_v36  ;;  %v956_v39 = vpop.f32.mrb[15].mxu0  ;;  %v976_v40 = vpop.f32.mrb[15].mxu1 }
 0x3b4   :  { %686 = vst [vmem:[#allocation7 + $0x8] sm:$0xff] %v641_v37  ;;  %688 = vst [vmem:[#allocation7 + $0x18] sm:$0xff] %v682_v38 }
 0x3b5   :  { %1075 = shalt.err (!%p1072_p6)
}
 0x3b6   :  { %s1076_s21 = scalar_lea.hbm %s1252_s3, 512 }
 0x3b7   :  { %p1077_p7 = scmp.ne.s32.totalorder %s1252_s3, %s1076_s21  ;;  %p1080_p8 = scmp.lt.u32.totalorder %s1076_s21, %s1252_s3 }
 0x3b9   :  { %p1082_p9 = pnand %p1080_p8, %p1077_p7 }
 0x3bb   :  { %1085 = shalt.err (!%p1082_p9)
}
 0x3bc   :  { %s1099_s26 = smov 128   ;;  %s1100_s27 = smov 8  }
 0x3bd   :  { %700 = dma.vmem_to_hbm [thread:$0]  %s695_s18, 512, %s1252_s3, [#allocation4], %s1099_s26, %s1099_s26, %s1100_s27  }
 0x3be   :  { %1090 = dma.done.wait [#allocation4], 512  }
 0x3bf   :  { %1091 = vsyncadd [#allocation4], 4294966784 }
 0x3c0   :  { %704 = vsyncpa [#allocation3], 1 }
 0x3c1   :  { %705 = vsyncpa [#allocation6], 1 }
 0x3c2   :  { %706 = vsyncpa [#allocation4], 1 }

</bundles_post_ra>
